<compile_context>
chip_gen: v5e
topology: v5e:2x2
jax: 0.10.0
libtpu: 0.0.40
codegen_flags: <defaults>
</compile_context>

<pallas_src>
import jax
import jax.numpy as jnp
import numpy as np
from jax.experimental import pallas as pl
from jax.experimental.pallas import tpu as pltpu


def rnn_kernel(x_ref, h0_ref, wxh_ref, whh_ref, bh_ref, wlin_ref, blin_ref,
               logits_ref, hout_ref, hs_scratch):
    B, T, V = x_ref.shape
    H = h0_ref.shape[1]

    whh = whh_ref[...]                       # (H, H), held in vregs
    bh = bh_ref[...]                         # (1, H)

    # Batched input projection (+ bias) for all time steps in one MXU pass:
    # (B*T, V) @ (V, H) -> (B*T, H), then viewed as (B, T, H).  The reshape
    # only collapses major dims (lane dim H untouched), so it is free.
    x_flat = x_ref[...].reshape(B * T, V)
    xp = (jnp.dot(x_flat, wxh_ref[...], preferred_element_type=jnp.float32)
          + bh).reshape(B, T, H)

    # Sequential recurrence, fully unrolled (T is small and static).  Only the
    # (B,H)@(H,H) matmul + tanh sit on the critical path; each step's hidden
    # state goes straight to the VMEM scratch with one sublane store.
    h = h0_ref[...].astype(jnp.float32)      # (B, H)
    for t in range(T):
        h = jnp.tanh(xp[:, t, :]
                     + jnp.dot(h, whh, preferred_element_type=jnp.float32))
        hs_scratch[:, t, :] = h

    # Final hidden state written exactly once (before the readout matmul).
    hout_ref[...] = h.astype(hout_ref.dtype)

    # Batched readout (eval-mode dropout == identity):
    # one (B*T, H) @ (H, V) matmul + bias + a single dense store.
    hs = hs_scratch[...].reshape(B * T, H)
    logits_ref[...] = (
        jnp.dot(hs, wlin_ref[...], preferred_element_type=jnp.float32)
        + blin_ref[...]
    ).astype(logits_ref.dtype)


@jax.jit
def simple_rnn_forward(x_btv, h0, Wxh, Whh, bh, W_lin, b_lin):
    """x_btv: (B, T, V) f32, h0: (B, H). Returns (logits (B*T, V), h_T (B, H))."""
    B, T, V = x_btv.shape
    H = h0.shape[1]

    wlin_t = W_lin.T                         # (H, V)  (nn.Linear weight is (V, H))
    bh2 = bh.reshape(1, H)
    blin2 = b_lin.reshape(1, V)

    vmem_spec = pl.BlockSpec(memory_space=pltpu.MemorySpace.VMEM)

    logits, h_T = pl.pallas_call(
        rnn_kernel,
        out_shape=(
            jax.ShapeDtypeStruct((B * T, V), jnp.float32),
            jax.ShapeDtypeStruct((B, H), jnp.float32),
        ),
        in_specs=[vmem_spec] * 7,
        out_specs=(vmem_spec, vmem_spec),
        scratch_shapes=[pltpu.VMEM((B, T, H), jnp.float32)],
    )(x_btv, h0, Wxh, Whh, bh2, wlin_t, blin2)

    return logits, h_T


def reference_forward(x_btv, h0, Wxh, Whh, bh, W_lin, b_lin):
    B, T, V = x_btv.shape
    H = h0.shape[1]
    h = h0
    hs = []
    for t in range(T):
        x_t = x_btv[:, t, :]
        h = jnp.tanh(x_t @ Wxh + h @ Whh + bh)
        hs.append(h[:, None, :])
    hs = jnp.concatenate(hs, axis=1).reshape(B * T, H)
    logits = hs @ W_lin.T + b_lin
    return logits, h


if __name__ == "__main__":
    # Small shapes consistent with the module's forward:
    B, T, H, V = 2, 8, 32, 16

    key = jax.random.PRNGKey(0)
    k_wxh, k_whh, k_wlin, k_blin, k_x, k_h = jax.random.split(key, 6)

    # Xavier-uniform-ish deterministic init (shapes from __init__).
    def xavier(k, shape):
        fan_in, fan_out = shape[0], shape[1]
        limit = jnp.sqrt(6.0 / (fan_in + fan_out))
        return jax.random.uniform(k, shape, jnp.float32, -limit, limit)

    Wxh = xavier(k_wxh, (V, H))
    Whh = xavier(k_whh, (H, H))
    bh = jnp.zeros((H,), jnp.float32)
    W_lin = xavier(k_wlin, (V, H))           # nn.Linear(H, V): weight (V, H)
    b_lin = jax.random.uniform(k_blin, (V,), jnp.float32, -0.1, 0.1)

    # One-hot style input (as F.one_hot(...).float() in the torch code).
    idx = jax.random.randint(k_x, (B, T), 0, V)
    x = jax.nn.one_hot(idx, V, dtype=jnp.float32)    # (B, T, V)
    h0 = jnp.zeros((B, H), jnp.float32)              # init_hidden

    logits, h_T = simple_rnn_forward(x, h0, Wxh, Whh, bh, W_lin, b_lin)
    logits = jax.block_until_ready(logits)
    h_T = jax.block_until_ready(h_T)

    logits_ref, h_ref = reference_forward(x, h0, Wxh, Whh, bh, W_lin, b_lin)
    assert logits.shape == (B * T, V)
    assert h_T.shape == (B, H)
    np.testing.assert_allclose(np.asarray(logits), np.asarray(logits_ref),
                               rtol=1e-5, atol=1e-5)
    np.testing.assert_allclose(np.asarray(h_T), np.asarray(h_ref),
                               rtol=1e-5, atol=1e-5)

    print("KERNEL_OK")
</pallas_src>

<mosaic_0001>
module attributes {stable_mosaic.version = 11 : i64} {
  func.func @rnn_kernel(%arg0: memref<2x8x16xf32, #tpu.memory_space<vmem>>, %arg1: memref<2x32xf32, #tpu.memory_space<vmem>>, %arg2: memref<16x32xf32, #tpu.memory_space<vmem>>, %arg3: memref<32x32xf32, #tpu.memory_space<vmem>>, %arg4: memref<1x32xf32, #tpu.memory_space<vmem>>, %arg5: memref<32x16xf32, #tpu.memory_space<vmem>>, %arg6: memref<1x16xf32, #tpu.memory_space<vmem>>, %arg7: memref<16x16xf32, #tpu.memory_space<vmem>>, %arg8: memref<2x32xf32, #tpu.memory_space<vmem>>, %arg9: memref<2x8x32xf32, #tpu.memory_space<vmem>>) attributes {dimension_semantics = [], scalar_prefetch = 0 : i64, scratch_operands = 1 : i64, tpu.core_type = #tpu.core_type<tc>} {
    %c0 = arith.constant 0 : index
    %c0_0 = arith.constant 0 : index
    %0 = vector.load %arg3[%c0, %c0_0] : memref<32x32xf32, #tpu.memory_space<vmem>>, vector<32x32xf32>
    %c0_1 = arith.constant 0 : index
    %c0_2 = arith.constant 0 : index
    %1 = vector.load %arg4[%c0_1, %c0_2] : memref<1x32xf32, #tpu.memory_space<vmem>>, vector<1x32xf32>
    %c0_3 = arith.constant 0 : index
    %c0_4 = arith.constant 0 : index
    %c0_5 = arith.constant 0 : index
    %2 = vector.load %arg0[%c0_3, %c0_4, %c0_5] : memref<2x8x16xf32, #tpu.memory_space<vmem>>, vector<2x8x16xf32>
    %3 = vector.shape_cast %2 : vector<2x8x16xf32> to vector<16x16xf32>
    %c0_6 = arith.constant 0 : index
    %c0_7 = arith.constant 0 : index
    %4 = vector.load %arg2[%c0_6, %c0_7] : memref<16x32xf32, #tpu.memory_space<vmem>>, vector<16x32xf32>
    %cst = arith.constant dense<0.000000e+00> : vector<16x32xf32>
    %5 = tpu.matmul %3, %4, %cst {dimension_numbers = #tpu.dot_dimension_numbers<[1], [0], [0], [1], [0, 0, 1, 1], [], []>} : vector<16x16xf32>, vector<16x32xf32>, vector<16x32xf32> -> vector<16x32xf32>
    %6 = vector.broadcast %1 : vector<1x32xf32> to vector<16x32xf32>
    %7 = arith.addf %5, %6 : vector<16x32xf32>
    %8 = vector.shape_cast %7 : vector<16x32xf32> to vector<2x8x32xf32>
    %c0_8 = arith.constant 0 : index
    %c0_9 = arith.constant 0 : index
    %9 = vector.load %arg1[%c0_8, %c0_9] : memref<2x32xf32, #tpu.memory_space<vmem>>, vector<2x32xf32>
    %10 = vector.extract_strided_slice %8 {offsets = [0, 0, 0], sizes = [2, 1, 32], strides = [1, 1, 1]} : vector<2x8x32xf32> to vector<2x1x32xf32>
    %11 = vector.shape_cast %10 : vector<2x1x32xf32> to vector<2x32xf32>
    %cst_10 = arith.constant dense<0.000000e+00> : vector<2x32xf32>
    %12 = tpu.matmul %9, %0, %cst_10 {dimension_numbers = #tpu.dot_dimension_numbers<[1], [0], [0], [1], [0, 0, 1, 1], [], []>} : vector<2x32xf32>, vector<32x32xf32>, vector<2x32xf32> -> vector<2x32xf32>
    %13 = arith.addf %11, %12 : vector<2x32xf32>
    %14 = math.tanh %13 : vector<2x32xf32>
    %c0_11 = arith.constant 0 : index
    %c0_12 = arith.constant 0 : index
    %c0_13 = arith.constant 0 : index
    %15 = vector.load %arg9[%c0_11, %c0_12, %c0_13] : memref<2x8x32xf32, #tpu.memory_space<vmem>>, vector<2x1x32xf32>
    %16 = vector.shape_cast %15 : vector<2x1x32xf32> to vector<2x32xf32>
    %17 = vector.shape_cast %14 : vector<2x32xf32> to vector<2x1x32xf32>
    tpu.vector_store %arg9[%c0_11, %c0_12, %c0_13], %17 {strides = array<i32>} : memref<2x8x32xf32, #tpu.memory_space<vmem>>, vector<2x1x32xf32>,
    %18 = vector.extract_strided_slice %8 {offsets = [0, 1, 0], sizes = [2, 1, 32], strides = [1, 1, 1]} : vector<2x8x32xf32> to vector<2x1x32xf32>
    %19 = vector.shape_cast %18 : vector<2x1x32xf32> to vector<2x32xf32>
    %cst_14 = arith.constant dense<0.000000e+00> : vector<2x32xf32>
    %20 = tpu.matmul %14, %0, %cst_14 {dimension_numbers = #tpu.dot_dimension_numbers<[1], [0], [0], [1], [0, 0, 1, 1], [], []>} : vector<2x32xf32>, vector<32x32xf32>, vector<2x32xf32> -> vector<2x32xf32>
    %21 = arith.addf %19, %20 : vector<2x32xf32>
    %22 = math.tanh %21 : vector<2x32xf32>
    %c0_15 = arith.constant 0 : index
    %c1 = arith.constant 1 : index
    %c0_16 = arith.constant 0 : index
    %23 = vector.load %arg9[%c0_15, %c1, %c0_16] : memref<2x8x32xf32, #tpu.memory_space<vmem>>, vector<2x1x32xf32>
    %24 = vector.shape_cast %23 : vector<2x1x32xf32> to vector<2x32xf32>
    %25 = vector.shape_cast %22 : vector<2x32xf32> to vector<2x1x32xf32>
    tpu.vector_store %arg9[%c0_15, %c1, %c0_16], %25 {strides = array<i32>} : memref<2x8x32xf32, #tpu.memory_space<vmem>>, vector<2x1x32xf32>,
    %26 = vector.extract_strided_slice %8 {offsets = [0, 2, 0], sizes = [2, 1, 32], strides = [1, 1, 1]} : vector<2x8x32xf32> to vector<2x1x32xf32>
    %27 = vector.shape_cast %26 : vector<2x1x32xf32> to vector<2x32xf32>
    %cst_17 = arith.constant dense<0.000000e+00> : vector<2x32xf32>
    %28 = tpu.matmul %22, %0, %cst_17 {dimension_numbers = #tpu.dot_dimension_numbers<[1], [0], [0], [1], [0, 0, 1, 1], [], []>} : vector<2x32xf32>, vector<32x32xf32>, vector<2x32xf32> -> vector<2x32xf32>
    %29 = arith.addf %27, %28 : vector<2x32xf32>
    %30 = math.tanh %29 : vector<2x32xf32>
    %c0_18 = arith.constant 0 : index
    %c2 = arith.constant 2 : index
    %c0_19 = arith.constant 0 : index
    %31 = vector.load %arg9[%c0_18, %c2, %c0_19] : memref<2x8x32xf32, #tpu.memory_space<vmem>>, vector<2x1x32xf32>
    %32 = vector.shape_cast %31 : vector<2x1x32xf32> to vector<2x32xf32>
    %33 = vector.shape_cast %30 : vector<2x32xf32> to vector<2x1x32xf32>
    tpu.vector_store %arg9[%c0_18, %c2, %c0_19], %33 {strides = array<i32>} : memref<2x8x32xf32, #tpu.memory_space<vmem>>, vector<2x1x32xf32>,
    %34 = vector.extract_strided_slice %8 {offsets = [0, 3, 0], sizes = [2, 1, 32], strides = [1, 1, 1]} : vector<2x8x32xf32> to vector<2x1x32xf32>
    %35 = vector.shape_cast %34 : vector<2x1x32xf32> to vector<2x32xf32>
    %cst_20 = arith.constant dense<0.000000e+00> : vector<2x32xf32>
    %36 = tpu.matmul %30, %0, %cst_20 {dimension_numbers = #tpu.dot_dimension_numbers<[1], [0], [0], [1], [0, 0, 1, 1], [], []>} : vector<2x32xf32>, vector<32x32xf32>, vector<2x32xf32> -> vector<2x32xf32>
    %37 = arith.addf %35, %36 : vector<2x32xf32>
    %38 = math.tanh %37 : vector<2x32xf32>
    %c0_21 = arith.constant 0 : index
    %c3 = arith.constant 3 : index
    %c0_22 = arith.constant 0 : index
    %39 = vector.load %arg9[%c0_21, %c3, %c0_22] : memref<2x8x32xf32, #tpu.memory_space<vmem>>, vector<2x1x32xf32>
    %40 = vector.shape_cast %39 : vector<2x1x32xf32> to vector<2x32xf32>
    %41 = vector.shape_cast %38 : vector<2x32xf32> to vector<2x1x32xf32>
    tpu.vector_store %arg9[%c0_21, %c3, %c0_22], %41 {strides = array<i32>} : memref<2x8x32xf32, #tpu.memory_space<vmem>>, vector<2x1x32xf32>,
    %42 = vector.extract_strided_slice %8 {offsets = [0, 4, 0], sizes = [2, 1, 32], strides = [1, 1, 1]} : vector<2x8x32xf32> to vector<2x1x32xf32>
    %43 = vector.shape_cast %42 : vector<2x1x32xf32> to vector<2x32xf32>
    %cst_23 = arith.constant dense<0.000000e+00> : vector<2x32xf32>
    %44 = tpu.matmul %38, %0, %cst_23 {dimension_numbers = #tpu.dot_dimension_numbers<[1], [0], [0], [1], [0, 0, 1, 1], [], []>} : vector<2x32xf32>, vector<32x32xf32>, vector<2x32xf32> -> vector<2x32xf32>
    %45 = arith.addf %43, %44 : vector<2x32xf32>
    %46 = math.tanh %45 : vector<2x32xf32>
    %c0_24 = arith.constant 0 : index
    %c4 = arith.constant 4 : index
    %c0_25 = arith.constant 0 : index
    %47 = vector.load %arg9[%c0_24, %c4, %c0_25] : memref<2x8x32xf32, #tpu.memory_space<vmem>>, vector<2x1x32xf32>
    %48 = vector.shape_cast %47 : vector<2x1x32xf32> to vector<2x32xf32>
    %49 = vector.shape_cast %46 : vector<2x32xf32> to vector<2x1x32xf32>
    tpu.vector_store %arg9[%c0_24, %c4, %c0_25], %49 {strides = array<i32>} : memref<2x8x32xf32, #tpu.memory_space<vmem>>, vector<2x1x32xf32>,
    %50 = vector.extract_strided_slice %8 {offsets = [0, 5, 0], sizes = [2, 1, 32], strides = [1, 1, 1]} : vector<2x8x32xf32> to vector<2x1x32xf32>
    %51 = vector.shape_cast %50 : vector<2x1x32xf32> to vector<2x32xf32>
    %cst_26 = arith.constant dense<0.000000e+00> : vector<2x32xf32>
    %52 = tpu.matmul %46, %0, %cst_26 {dimension_numbers = #tpu.dot_dimension_numbers<[1], [0], [0], [1], [0, 0, 1, 1], [], []>} : vector<2x32xf32>, vector<32x32xf32>, vector<2x32xf32> -> vector<2x32xf32>
    %53 = arith.addf %51, %52 : vector<2x32xf32>
    %54 = math.tanh %53 : vector<2x32xf32>
    %c0_27 = arith.constant 0 : index
    %c5 = arith.constant 5 : index
    %c0_28 = arith.constant 0 : index
    %55 = vector.load %arg9[%c0_27, %c5, %c0_28] : memref<2x8x32xf32, #tpu.memory_space<vmem>>, vector<2x1x32xf32>
    %56 = vector.shape_cast %55 : vector<2x1x32xf32> to vector<2x32xf32>
    %57 = vector.shape_cast %54 : vector<2x32xf32> to vector<2x1x32xf32>
    tpu.vector_store %arg9[%c0_27, %c5, %c0_28], %57 {strides = array<i32>} : memref<2x8x32xf32, #tpu.memory_space<vmem>>, vector<2x1x32xf32>,
    %58 = vector.extract_strided_slice %8 {offsets = [0, 6, 0], sizes = [2, 1, 32], strides = [1, 1, 1]} : vector<2x8x32xf32> to vector<2x1x32xf32>
    %59 = vector.shape_cast %58 : vector<2x1x32xf32> to vector<2x32xf32>
    %cst_29 = arith.constant dense<0.000000e+00> : vector<2x32xf32>
    %60 = tpu.matmul %54, %0, %cst_29 {dimension_numbers = #tpu.dot_dimension_numbers<[1], [0], [0], [1], [0, 0, 1, 1], [], []>} : vector<2x32xf32>, vector<32x32xf32>, vector<2x32xf32> -> vector<2x32xf32>
    %61 = arith.addf %59, %60 : vector<2x32xf32>
    %62 = math.tanh %61 : vector<2x32xf32>
    %c0_30 = arith.constant 0 : index
    %c6 = arith.constant 6 : index
    %c0_31 = arith.constant 0 : index
    %63 = vector.load %arg9[%c0_30, %c6, %c0_31] : memref<2x8x32xf32, #tpu.memory_space<vmem>>, vector<2x1x32xf32>
    %64 = vector.shape_cast %63 : vector<2x1x32xf32> to vector<2x32xf32>
    %65 = vector.shape_cast %62 : vector<2x32xf32> to vector<2x1x32xf32>
    tpu.vector_store %arg9[%c0_30, %c6, %c0_31], %65 {strides = array<i32>} : memref<2x8x32xf32, #tpu.memory_space<vmem>>, vector<2x1x32xf32>,
    %66 = vector.extract_strided_slice %8 {offsets = [0, 7, 0], sizes = [2, 1, 32], strides = [1, 1, 1]} : vector<2x8x32xf32> to vector<2x1x32xf32>
    %67 = vector.shape_cast %66 : vector<2x1x32xf32> to vector<2x32xf32>
    %cst_32 = arith.constant dense<0.000000e+00> : vector<2x32xf32>
    %68 = tpu.matmul %62, %0, %cst_32 {dimension_numbers = #tpu.dot_dimension_numbers<[1], [0], [0], [1], [0, 0, 1, 1], [], []>} : vector<2x32xf32>, vector<32x32xf32>, vector<2x32xf32> -> vector<2x32xf32>
    %69 = arith.addf %67, %68 : vector<2x32xf32>
    %70 = math.tanh %69 : vector<2x32xf32>
    %c0_33 = arith.constant 0 : index
    %c7 = arith.constant 7 : index
    %c0_34 = arith.constant 0 : index
    %71 = vector.load %arg9[%c0_33, %c7, %c0_34] : memref<2x8x32xf32, #tpu.memory_space<vmem>>, vector<2x1x32xf32>
    %72 = vector.shape_cast %71 : vector<2x1x32xf32> to vector<2x32xf32>
    %73 = vector.shape_cast %70 : vector<2x32xf32> to vector<2x1x32xf32>
    tpu.vector_store %arg9[%c0_33, %c7, %c0_34], %73 {strides = array<i32>} : memref<2x8x32xf32, #tpu.memory_space<vmem>>, vector<2x1x32xf32>,
    %c0_35 = arith.constant 0 : index
    %c0_36 = arith.constant 0 : index
    %74 = vector.load %arg8[%c0_35, %c0_36] : memref<2x32xf32, #tpu.memory_space<vmem>>, vector<2x32xf32>
    tpu.vector_store %arg8[%c0_35, %c0_36], %70 {strides = array<i32>} : memref<2x32xf32, #tpu.memory_space<vmem>>, vector<2x32xf32>,
    %c0_37 = arith.constant 0 : index
    %c0_38 = arith.constant 0 : index
    %c0_39 = arith.constant 0 : index
    %75 = vector.load %arg9[%c0_37, %c0_38, %c0_39] : memref<2x8x32xf32, #tpu.memory_space<vmem>>, vector<2x8x32xf32>
    %76 = vector.shape_cast %75 : vector<2x8x32xf32> to vector<16x32xf32>
    %c0_40 = arith.constant 0 : index
    %c0_41 = arith.constant 0 : index
    %77 = vector.load %arg5[%c0_40, %c0_41] : memref<32x16xf32, #tpu.memory_space<vmem>>, vector<32x16xf32>
    %cst_42 = arith.constant dense<0.000000e+00> : vector<16x16xf32>
    %78 = tpu.matmul %76, %77, %cst_42 {dimension_numbers = #tpu.dot_dimension_numbers<[1], [0], [0], [1], [0, 0, 1, 1], [], []>} : vector<16x32xf32>, vector<32x16xf32>, vector<16x16xf32> -> vector<16x16xf32>
    %c0_43 = arith.constant 0 : index
    %c0_44 = arith.constant 0 : index
    %79 = vector.load %arg6[%c0_43, %c0_44] : memref<1x16xf32, #tpu.memory_space<vmem>>, vector<1x16xf32>
    %80 = vector.broadcast %79 : vector<1x16xf32> to vector<16x16xf32>
    %81 = arith.addf %78, %80 : vector<16x16xf32>
    %c0_45 = arith.constant 0 : index
    %c0_46 = arith.constant 0 : index
    %82 = vector.load %arg7[%c0_45, %c0_46] : memref<16x16xf32, #tpu.memory_space<vmem>>, vector<16x16xf32>
    tpu.vector_store %arg7[%c0_45, %c0_46], %81 {strides = array<i32>} : memref<16x16xf32, #tpu.memory_space<vmem>>, vector<16x16xf32>,
    return
  }
}

</mosaic_0001>

<bundles_post_ra>
// kernel: simple_rnn_forward.1
= control target key start
LH: loop header
LB: loop body
LE: loop exit
PB: predicated region body
PF: predicated region fallthrough
CT: control target
= control target key end

     0   :  { %14 = vsyncpa [#allocation4], 0  ;;  %s765_s0 = inlined_call_operand.vmem [shape: f32[2,8,16], index: 0, kind: input, shape index: {}]   ;;  %s766_s1 = inlined_call_operand.vmem [shape: f32[2,32], index: 1, kind: input, shape index: {}]   ;;  %s767_s2 = inlined_call_operand.hbm [shape: f32[16,32], index: 2, kind: input, shape index: {}]   ;;  %s768_s3 = inlined_call_operand.vmem [shape: f32[32,32], index: 3, kind: input, shape index: {}]   ;;  %s769_s4 = inlined_call_operand.vmem [shape: f32[1,32], index: 4, kind: input, shape index: {}]   ;;  %s770_s5 = inlined_call_operand.vmem [shape: f32[32,16], index: 5, kind: input, shape index: {}]   ;;  %s771_s6 = inlined_call_operand.vmem [shape: f32[1,16], index: 6, kind: input, shape index: {}]   ;;  %s772_s7 = inlined_call_operand.hbm [shape: f32[16,16], index: 7, kind: output, shape index: {0}]   ;;  %s773_s8 = inlined_call_operand.hbm [shape: f32[2,32], index: 8, kind: output, shape index: {1}]  }
   0x1   :  { %15 = vsyncpa [#allocation5], 0 }
   0x2   :  { %16 = vsyncpa [#allocation8], 0  ;;  %s25_s29 = sshll.u32 %s767_s2, 4  ;;  %s607_s30 = smov [#allocation3]   ;;  %s26_s29 = int_to_ptr.hbm [resolvable:$true] %s25_s29 }
   0x3   :  { %s27_s9 = sshll.u32 %s607_s30, 4  ;;  %s608_s10 = smov 128   ;;  %s28_s9 = int_to_ptr.vmem [resolvable:$true] %s27_s9 }
   0x4   :  { %s609_s11 = smov 8  }
   0x5   :  { %33 = dma.hbm_to_vmem [thread:$0]  %s26_s29, 256, %s28_s9, [#allocation4], %s608_s10, %s608_s10, %s609_s11  }
   0x6   :  { %601 = dma.done.wait [#allocation4], 256  }
   0x7   :  { %602 = vsyncadd [#allocation4], 4294967040  ;;  %v54_v0 = vld [vmem:[#allocation3 + $0x8] sm:$0xff]  ;;  %v53_v2 = vld [vmem:[#allocation3] sm:$0xff]  ;;  %vm58_vm0 = vcmask 130048   ;;  %vm89_vm1 = vcmask 261120  }
   0x8   :  { %v666_v1 = vld [vmem:[%s768_s3 + $0x18] sm:$0xff]  ;;  %79 = vmatpush.msra.mxu0 %v54_v0  ;;  %v48_v3 = vld [vmem:[%s768_s3 + $0x10] sm:$0xff]  ;;  %v51_v4 = vld [vmem:[%s765_s0] sm:$0xff]  ;;  %vm121_vm2 = vcmask 253952   ;;  %vm127_vm3 = vcmask 1041409   ;;  %vm159_vm4 = vcmask 254977  }
   0x9   :  { %105 = vmatpush.msra.mxu1 %v666_v1  ;;  %v47_v5 = vld [vmem:[%s768_s3 + $0x8] sm:$0xff]  ;;  %143 = vmatpush.msra.mxu3 %v666_v1  ;;  %v46_v6 = vld [vmem:[%s768_s3] sm:$0xff]  ;;  %vm197_vm5 = vcmask 256002   ;;  %vm236_vm6 = vcmask 257027   ;;  %vm275_vm7 = vcmask 258052   ;;  %vm314_vm8 = vcmask 259077  }
   0xa   :  { %258 = vmatpush.msra.mxu2 %v666_v1  ;;  %80 = vmatpush.msra.mxu0 %v53_v2  ;;  %v88_v7 = vld [vmem:[%s766_s1] sm:$0x3]  ;;  %v52_v8 = vld [vmem:[%s765_s0 + $0x8] sm:$0xff]  ;;  %vm353_vm9 = vcmask 260102   ;;  %vm392_vm10 = vcmask 261127   ;;  %s463_s2 = sshll.u32 %s773_s8, 4  ;;  %s464_s2 = int_to_ptr.hbm [resolvable:$true] %s463_s2 }
   0xb   :  { %106 = vmatpush.msra.mxu1 %v48_v3  ;;  %478 = vmatmul.msk.f32.vlgmr.msra.gmra.mxu0 %vm58_vm0, %v51_v4  ;;  %v495_v9 = vld [vmem:[%s769_s4] ss:$0 sm:$0xff]  ;;  %s611_s16 = smov [#allocation6]   ;;  %s449_s20 = sshll.u32 %s772_s7, 4  ;;  %s450_s20 = int_to_ptr.hbm [resolvable:$true] %s449_s20 }
   0xc   :  { %144 = vmatpush.msra.mxu3 %v48_v3  ;;  %259 = vmatpush.msra.mxu2 %v48_v3  ;;  %s447_s17 = sshll.u32 %s611_s16, 4  ;;  %s448_s17 = int_to_ptr.vmem [resolvable:$true] %s447_s17 }
   0xd   :  { %107 = vmatpush.msra.mxu1 %v47_v5  ;;  %336 = vmatpush.msrb.mxu0 %v666_v1 }
   0xe   :  { %145 = vmatpush.msra.mxu3 %v47_v5  ;;  %260 = vmatpush.msra.mxu2 %v47_v5 }
   0xf   :  { %108 = vmatpush.msra.mxu1 %v46_v6  ;;  %337 = vmatpush.msrb.mxu0 %v48_v3 }
  0x10   :  { %480 = vmatmul.msk.f32.vlgmr.msra.gmra.mxu1 %vm89_vm1, %v88_v7  ;;  %146 = vmatpush.msra.mxu3 %v46_v6 }
  0x11   :  { %219 = vmatpush.msrb.mxu1 %v666_v1  ;;  %261 = vmatpush.msra.mxu2 %v46_v6 }
  0x12   :  { %180 = vmatpush.msrb.mxu3 %v666_v1  ;;  %338 = vmatpush.msrb.mxu0 %v47_v5 }
  0x13   :  { %220 = vmatpush.msrb.mxu1 %v48_v3  ;;  %479 = vmatmul.msk.f32.gmra.mxu0 %vm58_vm0, %v52_v8 }
  0x14   :  { %181 = vmatpush.msrb.mxu3 %v48_v3  ;;  %339 = vmatpush.msrb.mxu0 %v46_v6 }
  0x15   :  { %221 = vmatpush.msrb.mxu1 %v47_v5 }
  0x16   :  { %182 = vmatpush.msrb.mxu3 %v47_v5 }
  0x17   :  { %222 = vmatpush.msrb.mxu1 %v46_v6 }
  0x18   :  { %183 = vmatpush.msrb.mxu3 %v46_v6 }
  0x19   :  { %375 = vmatpush.msra.mxu1 %v666_v1 }
  0x1b   :  { %376 = vmatpush.msra.mxu1 %v48_v3 }
  0x1d   :  { %377 = vmatpush.msra.mxu1 %v47_v5 }
  0x1f   :  { %378 = vmatpush.msra.mxu1 %v46_v6 }
  0x88   :  { %v82_v10 = vpop.f32.mrf.mxu0 }
  0x89   :  { %v699_v11 = vadd.f32 %v495_v9, %v82_v10 }
  0x8d   :  { %v110_v12 = vpop.f32.mrf.mxu1 }
  0x8e   :  { %v117_v13 = vadd.f32 %v110_v12, %v699_v11  ;;  %v114_v14 = vrot.slane %v110_v12, 1 }
  0x90   :  { %497 = vtanh.f32 %v117_v13  ;;  %v85_v15 = vpop.f32.mrf.mxu0 }
  0x91   :  { %v702_v16 = vadd.f32 %v495_v9, %v85_v15 }
  0x93   :  { %v118_v17 = vadd.f32 %v114_v14, %v702_v16 }
  0x95   :  { %499 = vtanh.f32 %v118_v17 }
  0x96   :  { %v498_v18 = vpop.eup %497 }
  0x97   :  { %122 = vst.msk [vmem:[#allocation2] sm:$0x1] %vm121_vm2, %v498_v18 }
  0x9b   :  { %v500_v19 = vpop.eup %499 }
  0x9c   :  { %123 = vst.msk [vmem:[#allocation2 + $0x8] sm:$0x1] %vm121_vm2, %v500_v19  ;;  %v126_v20 = vrot.slane %v500_v19, 7  ;;  %v406_v19 = vld [vmem:[%s770_s5 + $0x10] sm:$0xff] }
  0x9e   :  { %v128_v21 = vsel %vm127_vm3, %v126_v20, %v498_v18  ;;  %v407_v18 = vld [vmem:[%s770_s5 + $0x18] sm:$0xff]  ;;  %v405_v20 = vld [vmem:[%s770_s5 + $0x8] sm:$0xff] }
  0x9f   :  { %481 = vmatmul.msk.f32.vlgmr.msra.gmra.mxu3 %vm89_vm1, %v128_v21  ;;  %430 = vmatpush.msrb.mxu2 %v407_v18  ;;  %v404_v21 = vld [vmem:[%s770_s5] sm:$0xff]  ;;  %s610_s5 = smov [#allocation7]  }
  0xa0   :  { %297 = vmatpush.msra.mxu3 %v666_v1  ;;  %s461_s9 = sshll.u32 %s610_s5, 4  ;;  %s462_s9 = int_to_ptr.vmem [resolvable:$true] %s461_s9 }
  0xa1   :  { %431 = vmatpush.msrb.mxu2 %v406_v19 }
  0xa2   :  { %298 = vmatpush.msra.mxu3 %v48_v3 }
  0xa3   :  { %432 = vmatpush.msrb.mxu2 %v405_v20 }
  0xa4   :  { %299 = vmatpush.msra.mxu3 %v47_v5 }
  0xa5   :  { %433 = vmatpush.msrb.mxu2 %v404_v21 }
  0xa6   :  { %300 = vmatpush.msra.mxu3 %v46_v6 }
 0x122   :  { %v148_v22 = vpop.f32.mrf.mxu3 }
 0x123   :  { %v152_v23 = vrot.slane %v148_v22, 7  ;;  %v156_v24 = vadd.f32 %v148_v22, %v702_v16 }
 0x125   :  { %v155_v25 = vadd.f32 %v152_v23, %v699_v11  ;;  %501 = vtanh.f32 %v156_v24 }
 0x127   :  { %503 = vtanh.f32 %v155_v25 }
 0x12b   :  { %v502_v26 = vpop.eup %501 }
 0x12c   :  { %161 = vst.msk [vmem:[#allocation2 + $0x8] sm:$0x2] %vm159_vm4, %v502_v26 }
 0x12d   :  { %v504_v27 = vpop.eup %503 }
 0x12e   :  { %160 = vst.msk [vmem:[#allocation2] sm:$0x2] %vm159_vm4, %v504_v27  ;;  %v164_v28 = vrot.slane %v504_v27, 1 }
 0x130   :  { %v165_v29 = vsel %vm127_vm3, %v502_v26, %v164_v28 }
 0x131   :  { %482 = vmatmul.msk.f32.vlgmr.msrb.gmra.mxu3 %vm89_vm1, %v165_v29 }
 0x1b4   :  { %v185_v30 = vpop.f32.mrf.mxu3 }
 0x1b5   :  { %v189_v31 = vrot.slane %v185_v30, 6  ;;  %v190_v32 = vrot.slane %v185_v30, 7 }
 0x1b7   :  { %v193_v33 = vadd.f32 %v189_v31, %v699_v11  ;;  %v194_v34 = vadd.f32 %v190_v32, %v702_v16 }
 0x1b9   :  { %505 = vtanh.f32 %v193_v33 }
 0x1ba   :  { %507 = vtanh.f32 %v194_v34 }
 0x1bf   :  { %v506_v35 = vpop.eup %505 }
 0x1c0   :  { %v508_v36 = vpop.eup %507  ;;  %198 = vst.msk [vmem:[#allocation2] sm:$0x4] %vm197_vm5, %v506_v35  ;;  %v202_v37 = vrot.slane %v506_v35, 2 }
 0x1c1   :  { %199 = vst.msk [vmem:[#allocation2 + $0x8] sm:$0x4] %vm197_vm5, %v508_v36  ;;  %v203_v38 = vrot.slane %v508_v36, 1 }
 0x1c3   :  { %v204_v39 = vsel %vm127_vm3, %v203_v38, %v202_v37 }
 0x1c4   :  { %483 = vmatmul.msk.f32.vlgmr.msrb.gmra.mxu1 %vm89_vm1, %v204_v39 }
 0x241   :  { %v224_v40 = vpop.f32.mrf.mxu1 }
 0x242   :  { %v228_v41 = vrot.slane %v224_v40, 5  ;;  %v229_v42 = vrot.slane %v224_v40, 6 }
 0x244   :  { %v232_v43 = vadd.f32 %v228_v41, %v699_v11  ;;  %v233_v44 = vadd.f32 %v229_v42, %v702_v16 }
 0x246   :  { %509 = vtanh.f32 %v232_v43 }
 0x247   :  { %511 = vtanh.f32 %v233_v44 }
 0x24c   :  { %v510_v45 = vpop.eup %509 }
 0x24d   :  { %v512_v46 = vpop.eup %511  ;;  %237 = vst.msk [vmem:[#allocation2] sm:$0x8] %vm236_vm6, %v510_v45  ;;  %v241_v47 = vrot.slane %v510_v45, 3 }
 0x24e   :  { %238 = vst.msk [vmem:[#allocation2 + $0x8] sm:$0x8] %vm236_vm6, %v512_v46  ;;  %v242_v48 = vrot.slane %v512_v46, 2 }
 0x250   :  { %v243_v49 = vsel %vm127_vm3, %v242_v48, %v241_v47 }
 0x251   :  { %484 = vmatmul.msk.f32.vlgmr.msra.gmra.mxu2 %vm89_vm1, %v243_v49 }
 0x2d4   :  { %v263_v50 = vpop.f32.mrf.mxu2 }
 0x2d5   :  { %v267_v51 = vrot.slane %v263_v50, 4  ;;  %v268_v52 = vrot.slane %v263_v50, 5 }
 0x2d7   :  { %v271_v53 = vadd.f32 %v267_v51, %v699_v11  ;;  %v272_v54 = vadd.f32 %v268_v52, %v702_v16 }
 0x2d9   :  { %513 = vtanh.f32 %v271_v53 }
 0x2da   :  { %515 = vtanh.f32 %v272_v54 }
 0x2df   :  { %v514_v55 = vpop.eup %513 }
 0x2e0   :  { %v516_v56 = vpop.eup %515  ;;  %276 = vst.msk [vmem:[#allocation2] sm:$0x10] %vm275_vm7, %v514_v55  ;;  %v280_v57 = vrot.slane %v514_v55, 4 }
 0x2e1   :  { %277 = vst.msk [vmem:[#allocation2 + $0x8] sm:$0x10] %vm275_vm7, %v516_v56  ;;  %v281_v58 = vrot.slane %v516_v56, 3 }
 0x2e3   :  { %v282_v59 = vsel %vm127_vm3, %v281_v58, %v280_v57 }
 0x2e4   :  { %485 = vmatmul.msk.f32.vlgmr.msra.gmra.mxu3 %vm89_vm1, %v282_v59 }
 0x367   :  { %v302_v60 = vpop.f32.mrf.mxu3 }
 0x368   :  { %v306_v61 = vrot.slane %v302_v60, 3  ;;  %v307_v62 = vrot.slane %v302_v60, 4 }
 0x36a   :  { %v310_v63 = vadd.f32 %v306_v61, %v699_v11  ;;  %v311_v0 = vadd.f32 %v307_v62, %v702_v16 }
 0x36c   :  { %517 = vtanh.f32 %v310_v63 }
 0x36d   :  { %519 = vtanh.f32 %v311_v0 }
 0x372   :  { %v518_v1 = vpop.eup %517 }
 0x373   :  { %v520_v2 = vpop.eup %519  ;;  %315 = vst.msk [vmem:[#allocation2] sm:$0x20] %vm314_vm8, %v518_v1  ;;  %v319_v3 = vrot.slane %v518_v1, 5 }
 0x374   :  { %316 = vst.msk [vmem:[#allocation2 + $0x8] sm:$0x20] %vm314_vm8, %v520_v2  ;;  %v320_v4 = vrot.slane %v520_v2, 4 }
 0x376   :  { %v321_v5 = vsel %vm127_vm3, %v320_v4, %v319_v3 }
 0x377   :  { %486 = vmatmul.msk.f32.vlgmr.msrb.gmra.mxu0 %vm89_vm1, %v321_v5 }
 0x3f4   :  { %v341_v6 = vpop.f32.mrf.mxu0 }
 0x3f5   :  { %v345_v7 = vrot.slane %v341_v6, 2  ;;  %v346_v8 = vrot.slane %v341_v6, 3 }
 0x3f7   :  { %v349_v9 = vadd.f32 %v345_v7, %v699_v11  ;;  %v350_v10 = vadd.f32 %v346_v8, %v702_v16 }
 0x3f9   :  { %521 = vtanh.f32 %v349_v9 }
 0x3fa   :  { %523 = vtanh.f32 %v350_v10 }
 0x3ff   :  { %v522_v12 = vpop.eup %521 }
 0x400   :  { %v524_v13 = vpop.eup %523  ;;  %354 = vst.msk [vmem:[#allocation2] sm:$0x40] %vm353_vm9, %v522_v12  ;;  %v358_v14 = vrot.slane %v522_v12, 6 }
 0x401   :  { %355 = vst.msk [vmem:[#allocation2 + $0x8] sm:$0x40] %vm353_vm9, %v524_v13  ;;  %v359_v15 = vrot.slane %v524_v13, 5 }
 0x403   :  { %v360_v17 = vsel %vm127_vm3, %v359_v15, %v358_v14 }
 0x404   :  { %487 = vmatmul.msk.f32.vlgmr.msra.gmra.mxu1 %vm89_vm1, %v360_v17 }
 0x481   :  { %v380_v22 = vpop.f32.mrf.mxu1 }
 0x482   :  { %v384_v23 = vrot.slane %v380_v22, 1  ;;  %v385_v24 = vrot.slane %v380_v22, 2 }
 0x484   :  { %v388_v25 = vadd.f32 %v384_v23, %v699_v11  ;;  %v389_v26 = vadd.f32 %v385_v24, %v702_v16  ;;  %v496_v11 = vld [vmem:[%s771_s6] ss:$0 sm:$0xff] }
 0x486   :  { %525 = vtanh.f32 %v388_v25 }
 0x487   :  { %527 = vtanh.f32 %v389_v26 }
 0x48c   :  { %v526_v27 = vpop.eup %525 }
 0x48d   :  { %v528_v28 = vpop.eup %527  ;;  %393 = vst.msk [vmem:[#allocation2] sm:$0x80] %vm392_vm10, %v526_v27 }
 0x48e   :  { %394 = vst.msk [vmem:[#allocation2 + $0x8] sm:$0x80] %vm392_vm10, %v528_v28  ;;  %v397_v29 = vrot.slane %v528_v28, 7 }
 0x48f   :  { %400 = vst.msk [vmem:[#allocation7 - $0x7] sm:$0x80] %vm392_vm10, %v526_v27 }
 0x490   :  { %401 = vst.msk [vmem:[#allocation7 + $0x1] sm:$0x1] %vm121_vm2, %v397_v29 }
 0x491   :  { %466 = dma.vmem_to_hbm [thread:$0]  %s462_s9, 32, %s464_s2, [#allocation8]  }
 0x494   :  { %v402_v30 = vld [vmem:[#allocation2] sm:$0xff] }
 0x495   :  { %488 = vmatmul.msk.f32.vlgmr.msrb.gmra.mxu2 %vm89_vm1, %v402_v30  ;;  %v403_v31 = vld [vmem:[#allocation2 + $0x8] sm:$0xff] }
 0x49d   :  { %489 = vmatmul.msk.f32.gmra.mxu2 %vm89_vm1, %v403_v31 }
 0x518   :  { %v435_v16 = vpop.f32.mrf.mxu2 }
 0x519   :  { %v436_v32 = vadd.f32 %v496_v11, %v435_v16 }
 0x51b   :  { %441 = vst.msk [vmem:[#allocation6] sm:$0xff] %vm58_vm0, %v436_v32 }
 0x520   :  { %v438_v33 = vpop.f32.mrf.mxu2 }
 0x521   :  { %v439_v34 = vadd.f32 %v496_v11, %v438_v33 }
 0x523   :  { %442 = vst.msk [vmem:[#allocation6 + $0x8] sm:$0xff] %vm58_vm0, %v439_v34 }
 0x524   :  { %455 = dma.vmem_to_hbm [thread:$0]  %s448_s17, 256, %s450_s20, [#allocation5], %s608_s10, %s608_s10, %s609_s11  }
 0x525   :  { %603 = dma.done.wait [#allocation5], 256  }
 0x526   :  { %604 = vsyncadd [#allocation5], 4294967040 }
 0x527   :  { %605 = dma.done.wait [#allocation8], 32  }
 0x528   :  { %606 = vsyncadd [#allocation8], 4294967264 }
 0x529   :  { %475 = vsyncpa [#allocation4], 1 }
 0x52a   :  { %476 = vsyncpa [#allocation5], 1 }
 0x52b   :  { %477 = vsyncpa [#allocation8], 1 }

</bundles_post_ra>
